<compile_context>
chip_gen: v7x
topology: tpu7x:2x2x1
jax: 0.10.0
libtpu: 0.0.40
codegen_flags: <defaults>
</compile_context>

<pallas_src>
import functools

import jax
import jax.numpy as jnp
from jax.experimental import pallas as pl
from jax.experimental.pallas import tpu as pltpu


_SUBLANE_MULTIPLE = {4: 8, 2: 16, 1: 32}      # packed sublane rows per vreg
_VMEM_SOFT_BUDGET = 12 * 1024 * 1024          # stay under v5e's 16 MiB default


def _round_up(v: int, m: int) -> int:
    return ((v + m - 1) // m) * m


def _add_pe_flat_kernel(x_ref, pe_ref, o_ref, *, batch):
    # x_ref : [tp, batch*d_model]   current tile of patch embeddings
    # pe_ref: [tp, d_model]         matching tile of positional encodings
    pe_blk = pe_ref[...]
    if batch == 1:
        pe_rep = pe_blk
    else:
        # out[p, b*D + j] = x[p, b*D + j] + pe[p, j].  This branch is only
        # taken when d_model % 128 == 0, so the replication is whole-vreg
        # copies (no cross-lane XLU shuffles) hidden under the DMAs.
        pe_rep = jnp.concatenate([pe_blk] * batch, axis=1)
    o_ref[...] = x_ref[...] + pe_rep


def _add_pe_bcast_kernel(x_ref, pe_ref, o_ref):
    # x_ref: [tp, batch, td], pe_ref: [tp, 1, td] -> broadcast over batch sublanes.
    o_ref[...] = x_ref[...] + pe_ref[...]


def learned_positional_embeddings(
    x: jax.Array,
    pe: jax.Array,
    *,
    target_tile_bytes: int = 2 * 1024 * 1024,
    donate_x: bool = False,
) -> jax.Array:
    """x: [patches, batch, d_model]; pe: [max_len, 1, d_model] -> x + pe[:patches]."""
    patches, batch, d_model = x.shape
    max_len = pe.shape[0]
    assert pe.shape == (max_len, 1, d_model)
    assert patches <= max_len

    dtype = x.dtype
    itemsize = jnp.dtype(dtype).itemsize
    sub = _SUBLANE_MULTIPLE.get(itemsize, 8)

    # Enforce a sane tile budget independent of the caller: small tiles tank
    # bandwidth utilization; big ones blow the default scoped-VMEM limit.
    target_tile_bytes = int(min(max(target_tile_bytes, 512 * 1024), 2 * 1024 * 1024))

    # NOTE: pe is cast to x.dtype before the add (negligible vs. PyTorch's
    # promote-then-add for an embedding add; documented for parity tests).
    pe_rows = pe[:patches, 0, :].astype(dtype)                # [patches, d_model]

    flops = int(patches * batch * d_model)
    bytes_accessed = int((2 * patches * batch * d_model + patches * d_model) * itemsize)
    cost = pl.CostEstimate(flops=flops, transcendentals=0, bytes_accessed=bytes_accessed)
    io_alias = {0: 0} if donate_x else {}

    # Flattened 2-D path: lane axis = batch*d_model (lane-dense output); only
    # when the in-kernel lane replication of pe is free (batch == 1 or
    # d_model % 128 == 0) and a minimal tile fits the VMEM budget.
    use_flat = (batch == 1) or (
        d_model % 128 == 0
        and 4 * sub * batch * d_model * itemsize <= _VMEM_SOFT_BUDGET
    )

    if use_flat:
        lanes = batch * d_model
        row_bytes = lanes * itemsize
        if patches <= sub:
            tp = patches                                       # full extent: legal
        else:
            tp = max(sub, (target_tile_bytes // max(row_bytes, 1)) // sub * sub)
            # Guarantee >= 2 grid blocks so v7x megacore can shard the patch axis.
            tp = min(tp, _round_up(pl.cdiv(patches, 2), sub))
        grid = (pl.cdiv(patches, tp),)

        x2 = x.reshape(patches, lanes)                         # free row-major view
        kernel = functools.partial(_add_pe_flat_kernel, batch=batch)

        out2 = pl.pallas_call(
            kernel,
            out_shape=jax.ShapeDtypeStruct((patches, lanes), dtype),
            grid_spec=pltpu.PrefetchScalarGridSpec(
                num_scalar_prefetch=0,
                grid=grid,
                in_specs=[
                    pl.BlockSpec((tp, lanes), lambda i: (i, 0)),      # x tile
                    pl.BlockSpec((tp, d_model), lambda i: (i, 0)),    # pe tile (per-step)
                ],
                out_specs=pl.BlockSpec((tp, lanes), lambda i: (i, 0)),
            ),
            compiler_params=pltpu.CompilerParams(
                dimension_semantics=("parallel",)),
            cost_estimate=cost,
            input_output_aliases=io_alias,
        )(x2, pe_rows)
        return out2.reshape(patches, batch, d_model)

    # General 3-D path: blocks [tp, batch, td]; pe block [tp, 1, td] broadcasts
    # over the batch sublanes (cheap sublane replication, no lane shuffles).
    padded_batch = _round_up(batch, sub)                        # vreg/VMEM footprint
    if d_model % 128 == 0:
        td = (target_tile_bytes // max(sub * padded_batch * itemsize, 1)) // 128 * 128
        td = max(128, min(d_model, td))
    else:
        td = d_model                                            # full extent: legal
    block_row_bytes = padded_batch * td * itemsize
    tp = max(1, target_tile_bytes // max(block_row_bytes, 1))
    tp = min(tp, patches)
    if patches > 1:
        tp = min(tp, pl.cdiv(patches, 2))                       # >= 2 patch blocks
    grid = (pl.cdiv(patches, tp), pl.cdiv(d_model, td))

    pe3 = pe_rows.reshape(patches, 1, d_model)

    out = pl.pallas_call(
        _add_pe_bcast_kernel,
        out_shape=jax.ShapeDtypeStruct((patches, batch, d_model), dtype),
        grid_spec=pltpu.PrefetchScalarGridSpec(
            num_scalar_prefetch=0,
            grid=grid,
            in_specs=[
                pl.BlockSpec((tp, batch, td), lambda i, j: (i, 0, j)),
                pl.BlockSpec((tp, 1, td), lambda i, j: (i, 0, j)),
            ],
            out_specs=pl.BlockSpec((tp, batch, td), lambda i, j: (i, 0, j)),
        ),
        compiler_params=pltpu.CompilerParams(
            dimension_semantics=("parallel", "parallel")),
        cost_estimate=cost,
        input_output_aliases=io_alias,
    )(x, pe3)
    return out


if __name__ == "__main__":
    key = jax.random.PRNGKey(0)
    kx, kp = jax.random.split(key)

    # Config 1: ViT-ish, lane-dense d_model (multiple of 128) -> flattened 2-D
    # path, 2-block parallel grid with a ragged final block.
    patches, batch, d_model, max_len = 200, 2, 128, 512
    x = jax.random.normal(kx, (patches, batch, d_model), dtype=jnp.float32)
    pe = jax.random.normal(kp, (max_len, 1, d_model), dtype=jnp.float32)
    out = jax.block_until_ready(learned_positional_embeddings(x, pe))
    ref = x + pe[:patches]
    assert out.shape == (patches, batch, d_model)
    assert jnp.allclose(out, ref, atol=1e-6, rtol=1e-6)

    # Config 2: tiny shapes from the original module test (batch=2, d_model=32,
    # not a multiple of 128) -> 3-D broadcast path.
    patches2, batch2, d_model2, max_len2 = 8, 2, 32, 64
    x_s = jax.random.normal(kx, (patches2, batch2, d_model2), dtype=jnp.float32)
    pe_s = jax.random.normal(kp, (max_len2, 1, d_model2), dtype=jnp.float32)
    out_s = jax.block_until_ready(learned_positional_embeddings(x_s, pe_s))
    assert jnp.allclose(out_s, x_s + pe_s[:patches2], atol=1e-6, rtol=1e-6)

    # Config 3: batch=1, bf16 -> flattened path without replication, 16-row
    # sublane rounding for the packed dtype.
    patches3, batch3, d_model3, max_len3 = 48, 1, 256, 128
    x_b = jax.random.normal(kx, (patches3, batch3, d_model3), dtype=jnp.bfloat16)
    pe_b = jax.random.normal(kp, (max_len3, 1, d_model3), dtype=jnp.bfloat16)
    out_b = jax.block_until_ready(learned_positional_embeddings(x_b, pe_b))
    ref_b = x_b + pe_b[:patches3]
    assert jnp.allclose(out_b.astype(jnp.float32), ref_b.astype(jnp.float32),
                        atol=1e-2, rtol=1e-2)

    print("KERNEL_OK")
</pallas_src>

<mosaic_0001>
module attributes {stable_mosaic.version = 11 : i64} {
  func.func @_add_pe_flat_kernel(%arg0: i32, %arg1: memref<104x256xf32, #tpu.memory_space<vmem>>, %arg2: memref<104x128xf32, #tpu.memory_space<vmem>>, %arg3: memref<104x256xf32, #tpu.memory_space<vmem>>) attributes {dimension_semantics = [#tpu.dimension_semantics<parallel>], iteration_bounds = array<i64: 2>, scalar_prefetch = 0 : i64, scratch_operands = 0 : i64, tpu.core_type = #tpu.core_type<tc>, window_params = [{transform_indices = @transform_0, window_bounds = array<i64: 104, 256>}, {transform_indices = @transform_1, window_bounds = array<i64: 104, 128>}, {transform_indices = @transform_2, window_bounds = array<i64: 104, 256>}]} {
    %c0 = arith.constant 0 : index
    %c0_0 = arith.constant 0 : index
    %0 = vector.load %arg2[%c0, %c0_0] : memref<104x128xf32, #tpu.memory_space<vmem>>, vector<104x128xf32>
    %1 = tpu.concatenate %0, %0 in 1 : vector<104x128xf32>, vector<104x128xf32> -> vector<104x256xf32>
    %c0_1 = arith.constant 0 : index
    %c0_2 = arith.constant 0 : index
    %2 = vector.load %arg1[%c0_1, %c0_2] : memref<104x256xf32, #tpu.memory_space<vmem>>, vector<104x256xf32>
    %3 = arith.addf %2, %1 : vector<104x256xf32>
    %c0_3 = arith.constant 0 : index
    %c0_4 = arith.constant 0 : index
    %4 = vector.load %arg3[%c0_3, %c0_4] : memref<104x256xf32, #tpu.memory_space<vmem>>, vector<104x256xf32>
    tpu.vector_store %arg3[%c0_3, %c0_4], %3 {strides = array<i32>} : memref<104x256xf32, #tpu.memory_space<vmem>>, vector<104x256xf32>,
    return
  }
  func.func @transform_0(%arg0: i32) -> (i32, i32) {
    %c0_i32 = arith.constant 0 : i32
    %c0_i32_0 = arith.constant 0 : i32
    return %arg0, %c0_i32 : i32, i32
  }
  func.func @transform_1(%arg0: i32) -> (i32, i32) {
    %c0_i32 = arith.constant 0 : i32
    %c0_i32_0 = arith.constant 0 : i32
    return %arg0, %c0_i32 : i32, i32
  }
  func.func @transform_2(%arg0: i32) -> (i32, i32) {
    %c0_i32 = arith.constant 0 : i32
    %c0_i32_0 = arith.constant 0 : i32
    return %arg0, %c0_i32 : i32, i32
  }
}

</mosaic_0001>

<bundles_post_ra>
// kernel: tpu_custom_call.1
= control target key start
LH: loop header
LB: loop body
LE: loop exit
PB: predicated region body
PF: predicated region fallthrough
CT: control target
= control target key end

     0   :  { %7 = vsyncpa [#allocation3], 0  ;;  %s976_s0 = inlined_call_operand.hbm [shape: f32[200,256], index: 0, kind: input, shape index: {}]   ;;  %s977_s1 = inlined_call_operand.hbm [shape: f32[200,128], index: 1, kind: input, shape index: {}]   ;;  %s978_s2 = inlined_call_operand.hbm [shape: f32[200,256], index: 2, kind: output, shape index: {}]  }
   0x1   :  { %9 = vsyncpa [#allocation3 + $0x1], 0 }
   0x2   :  { %10 = vsyncpa [#allocation6], 0 }
   0x3   :  { %12 = vsyncpa [#allocation6 + $0x1], 0 }
   0x4   :  { %13 = vsyncpa [#allocation4], 0 }
   0x5   :  { %15 = vsyncpa [#allocation4 + $0x1], 0  ;;  %s678_s9 = smov 0   ;;  %s680_s10 = smov 0  }
   0x6   :  { %s682_s11 = smov 0   ;;  %s684_s12 = smov 0  }
   0x7 LB: > { %s699_s13 = sadd.s32 4294967295, %s652_s12   ;;  %s442_s14 = sadd.s32 4294967294, %s652_s12   ;;  %s652_s12 = sphi %s684_s12, %s990_s12   ;;  %s648_s11 = sphi %s682_s11, %s989_s11   ;;  %s644_s10 = sphi %s680_s10, %s988_s10   ;;  %s640_s9 = sphi %s678_s9, %s987_s9  }
   0x8   : > { %s703_s15 = sadd.s32 1, %s652_s12   ;;  %s28_s16 = sadd.s32 1, %s648_s11 }
   0x9   : > { %s25_s17 = ssub.s32 %s652_s12, %s703_s15  ;;  %p35_p0 = scmp.ne.s32.totalorder %s648_s11, %s644_s10 }
   0xa   : > { %p26_p1 = scmp.eq.s32.totalorder %s25_s17, 0  ;;  %p36_p2 = scmp.eq.s32.totalorder %s652_s12, 0 }
   0xb   : > { %p41_p3 = scmp.ne.s32.totalorder %s644_s10, %s640_s9  ;;  %p42_p4 = scmp.eq.s32.totalorder %s699_s13, 0 }
   0xc   : > { %s715_s18 = scalar_select %p26_p1, %s648_s11, %s28_s16  }
   0xd   : > { %p717_p5 = por %p36_p2, %p35_p0  ;;  %p721_p6 = por %p42_p4, %p41_p3 }
   0xe   : > { %p91_p7 = scmp.eq.s32.totalorder %s699_s13, 1  ;;  %p97_p8 = scmp.eq.s32.totalorder %s442_s14, 1 }
   0xf   : > { %p979_p11 = scmp.ge.s32.totalorder %s652_s12, 2 }
  0x10   : > { %p726_p9 = por %p91_p7, %p35_p0  ;;  %p730_p10 = por %p97_p8, %p41_p3 }
  0x11   : > { %113 = sbr.rel (%p979_p11) target bundleno = 94 (0x5e), region = 16 }
  0x12   : > { %s982_s21 = scalar_select %p726_p9, 1, 0 }
  0x13   : > { %s983_s22 = scalar_select %p730_p10, 1, 0 }
  0x18   : > { %116 = sbr.rel (!%p717_p5) target bundleno = 59 (0x3b), region = 20  ;;  %s117_s23 = sand.u32 (%p717_p5), 1, %s648_s11  }
  0x19   : > { %s122_s24 = smul.u32 (%p717_p5), 13, %s652_s12  ;;  %s744_s29 = scalar_lea.sflag (%p717_p5), [#allocation3], %s117_s23 }
  0x1a   : > { %s476_s25 = smul.u32 (%p717_p5), 208, %s117_s23 }
  0x1b   : > { %s123_s26 = ssub.s32 (%p717_p5), 25, %s122_s24 }
  0x1c   : > { %p124_p12 = scmp.lt.s32.totalorder (%p717_p5), %s123_s26, 13  ;;  %s121_s30 = scalar_lea.vmem (%p717_p5), [#allocation2], %s476_s25 }
  0x1f   : > { %s992_s26 = smov (!%p124_p12, %s123_s26), 13 }
  0x20   : > { %s741_s27 = sshll.u32 %s992_s26, 8 }
  0x21   : > { %s129_s28 = ssub.s32 3328, %s741_s27 }
  0x22   : > { %130 = vsyncadd %s744_s29, %s129_s28  ;;  %p447_p13 = scmp.ne.s32.totalorder %s741_s27, 0  ;;  %s474_s3 = smul.u32 3328, %s652_s12 }
  0x23   : > { %s136_s4 = sshll.u32 %s121_s30, 4  ;;  %s530_s17 = scalar_lea.hbm %s976_s0, 6400  ;;  %s754_s4 = int_to_ptr.vmem [resolvable:$true] %s136_s4 }
  0x24   : > { %s752_s7 = scalar_lea.hbm %s976_s0, %s474_s3 }
  0x25   : > { %s526_s8 = scalar_lea.hbm %s752_s7, %s741_s27  ;;  %p531_p3 = scmp.lt.u32.totalorder %s752_s7, %s976_s0 }
  0x26   : > { %p527_p0 = scmp.ne.s32.totalorder %s752_s7, %s526_s8  ;;  %p532_p4 = scmp.lt.u32.totalorder %s530_s17, %s526_s8 }
  0x27   : > { %p534_p8 = scmp.lt.u32.totalorder %s526_s8, %s752_s7 }
  0x28   : > { %p528_p1 = pnand %p527_p0, %p447_p13  ;;  %p533_p7 = por %p532_p4, %p531_p3 }
  0x2a   : > { %p529_p2 = pneg %p528_p1  ;;  %p535_p12 = por %p534_p8, %p533_p7 }
  0x2c   : > { %p536_p11 = pnand %p535_p12, %p529_p2 }
  0x2e   : > { %539 = shalt.err (!%p536_p11)
}
  0x2f   : > { %s540_s25 = scalar_lea.vmem %s754_s4, %s741_s27  ;;  %s654_s26 = smov [#allocation2]  }
  0x30   : > { %p541_p0 = scmp.ne.s32.totalorder %s754_s4, %s540_s25  ;;  %s544_s28 = sshll.u32 %s654_s26, 4  ;;  %s545_s28 = int_to_ptr.vmem [resolvable:$false] %s544_s28 }
  0x31   : > { %s546_s30 = scalar_lea.vmem %s545_s28, 6656  ;;  %p547_p9 = scmp.lt.s32.totalorder %s754_s4, %s545_s28 }
  0x32   : > { %p542_p1 = pnand %p541_p0, %p447_p13  ;;  %p548_p3 = scmp.lt.s32.totalorder %s546_s30, %s540_s25 }
  0x34   : > { %p543_p10 = pneg %p542_p1  ;;  %p549_p4 = por %p548_p3, %p547_p9 }
  0x36   : > { %p550_p7 = pnand %p549_p4, %p543_p10 }
  0x38   : > { %553 = shalt.err (!%p550_p7)
}
  0x39   : > { %s655_s3 = smov 256   ;;  %s656_s5 = smov 16  }
  0x3a   : > { %142 = dma.hbm_to_vmem [thread:$0]  (%p447_p13), %s752_s7, %s741_s27, %s754_s4, %s744_s29, %s655_s3, %s655_s3, %s656_s5  }
  0x3b PF: > { %145 = sbr.rel (!%p717_p5) target bundleno = 94 (0x5e), region = 24  ;;  %s146_s6 = sand.u32 (%p717_p5), 1, %s648_s11  }
  0x3c   : > { %s151_s8 = smul.u32 (%p717_p5), 13, %s652_s12  ;;  %s788_s24 = scalar_lea.sflag (%p717_p5), [#allocation6], %s146_s6 }
  0x3d   : > { %s477_s14 = smul.u32 (%p717_p5), 104, %s146_s6 }
  0x3e   : > { %s152_s16 = ssub.s32 (%p717_p5), 25, %s151_s8 }
  0x3f   : > { %p153_p9 = scmp.lt.s32.totalorder (%p717_p5), %s152_s16, 13  ;;  %s150_s27 = scalar_lea.vmem (%p717_p5), [#allocation5], %s477_s14 }
  0x42   : > { %s994_s16 = smov (!%p153_p9, %s152_s16), 13 }
  0x43   : > { %s785_s17 = sshll.u32 %s994_s16, 7 }
  0x44   : > { %s157_s23 = ssub.s32 1664, %s785_s17 }
  0x45   : > { %158 = vsyncadd %s788_s24, %s157_s23  ;;  %p453_p5 = scmp.ne.s32.totalorder %s785_s17, 0  ;;  %s470_s19 = smul.u32 1664, %s652_s12 }
  0x46   : > { %s163_s29 = sshll.u32 %s150_s27, 4  ;;  %s558_s3 = scalar_lea.hbm %s977_s1, 3200  ;;  %s798_s29 = int_to_ptr.vmem [resolvable:$true] %s163_s29 }
  0x47   : > { %s796_s25 = scalar_lea.hbm %s977_s1, %s470_s19 }
  0x48   : > { %s554_s26 = scalar_lea.hbm %s796_s25, %s785_s17  ;;  %p559_p2 = scmp.lt.u32.totalorder %s796_s25, %s977_s1 }
  0x49   : > { %p555_p10 = scmp.ne.s32.totalorder %s796_s25, %s554_s26  ;;  %p560_p8 = scmp.lt.u32.totalorder %s558_s3, %s554_s26 }
  0x4a   : > { %p562_p0 = scmp.lt.u32.totalorder %s554_s26, %s796_s25 }
  0x4b   : > { %p556_p11 = pnand %p555_p10, %p453_p5  ;;  %p561_p12 = por %p560_p8, %p559_p2 }
  0x4d   : > { %p557_p13 = pneg %p556_p11  ;;  %p563_p1 = por %p562_p0, %p561_p12 }
  0x4f   : > { %p564_p3 = pnand %p563_p1, %p557_p13 }
  0x51   : > { %567 = shalt.err (!%p564_p3)
}
  0x52   : > { %s568_s8 = scalar_lea.vmem %s798_s29, %s785_s17  ;;  %s657_s14 = smov [#allocation5]  }
  0x53   : > { %p569_p4 = scmp.ne.s32.totalorder %s798_s29, %s568_s8  ;;  %s572_s16 = sshll.u32 %s657_s14, 4  ;;  %s573_s16 = int_to_ptr.vmem [resolvable:$false] %s572_s16 }
  0x54   : > { %s574_s23 = scalar_lea.vmem %s573_s16, 3328  ;;  %p575_p10 = scmp.lt.s32.totalorder %s798_s29, %s573_s16 }
  0x55   : > { %p570_p7 = pnand %p569_p4, %p453_p5  ;;  %p576_p11 = scmp.lt.s32.totalorder %s574_s23, %s568_s8 }
  0x57   : > { %p571_p9 = pneg %p570_p7  ;;  %p577_p2 = por %p576_p11, %p575_p10 }
  0x59   : > { %p578_p8 = pnand %p577_p2, %p571_p9 }
  0x5b   : > { %581 = shalt.err (!%p578_p8)
}
  0x5c   : > { %s658_s27 = smov 128   ;;  %s659_s19 = smov 8  }
  0x5d   : > { %169 = dma.hbm_to_vmem [thread:$0]  (%p453_p5), %s796_s25, %s785_s17, %s798_s29, %s788_s24, %s658_s27, %s658_s27, %s659_s19  }
  0x5e PF: > { %p457_p13 = scmp.ge.s32.totalorder %s652_s12, 1  ;;  %p171_p12 = scmp.lt.s32.totalorder %s652_s12, 3 }
  0x60   : > { %p172_p0 = pnand %p457_p13, %p171_p12 }
  0x61   : > { %s828_s4 = sand.u32 (!%p172_p0), 1, %s644_s10  }
  0x62   : > { %175 = sbr.rel (%p172_p0) target bundleno = 157 (0x9d), region = 28  ;;  %s178_s26 = scalar_lea.sflag (!%p172_p0), [#allocation3], %s828_s4 }
  0x63   : > { %s478_s7 = smul.u32 (!%p172_p0), 208, %s828_s4 }
  0x65   : > { %s832_s28 = scalar_lea.vmem (!%p172_p0), [#allocation2], %s478_s7 }
  0x69   : > { %627 = dma.done.wait (%p721_p6), %s178_s26, 3328  }
  0x6a   : > { %629 = vsyncadd (%p721_p6), %s178_s26, 4294963968  ;;  %s479_s17 = smul.u32 104, %s828_s4  ;;  %s187_s24 = scalar_lea.sflag [#allocation6], %s828_s4 }
  0x6c   : > { %s840_s29 = scalar_lea.vmem [#allocation5], %s479_s17 }
  0x6d   : > { %631 = dma.done.wait (%p721_p6), %s187_s24, 1664  }
  0x6e   : > { %633 = vsyncadd (%p721_p6), %s187_s24, 4294965632  ;;  %v233_v0 = vld [vmem:[%s840_s29] sm:$0xff]  ;;  %v247_v2 = vld [vmem:[%s832_s28 + $0x8] sm:$0xff]  ;;  %s855_s20 = scalar_lea.vmem [#allocation7], %s478_s7  ;;  %s325_s25 = scalar_lea.sflag [#allocation4], %s828_s4 }
  0x6f   : > { %v246_v1 = vld [vmem:[%s832_s28] sm:$0xff]  ;;  %v273_v4 = vadd.f32 %v247_v2, %v233_v0  ;;  %v248_v6 = vld [vmem:[%s832_s28 + $0x10] sm:$0xff]  ;;  %v249_v7 = vld [vmem:[%s832_s28 + $0x18] sm:$0xff]  ;;  %p984_p6 = scmp.ne.s32.totalorder %s982_s21, 0 }
  0x70   : > { %v272_v3 = vadd.f32 %v246_v1, %v233_v0  ;;  %v234_v5 = vld [vmem:[%s840_s29 + $0x8] sm:$0xff]  ;;  %v235_v10 = vld [vmem:[%s840_s29 + $0x10] sm:$0xff]  ;;  %v236_v15 = vld [vmem:[%s840_s29 + $0x18] sm:$0xff]  ;;  %s332_s30 = smul.u32 (%p984_p6), 13, %s699_s13 }
  0x71   : > { %v274_v8 = vadd.f32 %v248_v6, %v234_v5  ;;  %v275_v9 = vadd.f32 %v249_v7, %v234_v5  ;;  %v250_v11 = vld [vmem:[%s832_s28 + $0x20] sm:$0xff]  ;;  %v251_v12 = vld [vmem:[%s832_s28 + $0x28] sm:$0xff]  ;;  %299 = vst [vmem:[%s855_s20 + $0x8] sm:$0xff] %v273_v4  ;;  %v252_v16 = vld [vmem:[%s832_s28 + $0x30] sm:$0xff] }
  0x72   : > { %298 = vst [vmem:[%s855_s20] sm:$0xff] %v272_v3  ;;  %v276_v13 = vadd.f32 %v250_v11, %v235_v10  ;;  %v277_v14 = vadd.f32 %v251_v12, %v235_v10  ;;  %v253_v17 = vld [vmem:[%s832_s28 + $0x38] sm:$0xff]  ;;  %v278_v18 = vadd.f32 %v252_v16, %v236_v15  ;;  %v254_v21 = vld [vmem:[%s832_s28 + $0x40] sm:$0xff]  ;;  %v255_v22 = vld [vmem:[%s832_s28 + $0x48] sm:$0xff]  ;;  %s333_s3 = ssub.s32 (%p984_p6), 25, %s332_s30 }
  0x73   : > { %300 = vst [vmem:[%s855_s20 + $0x10] sm:$0xff] %v274_v8  ;;  %301 = vst [vmem:[%s855_s20 + $0x18] sm:$0xff] %v275_v9  ;;  %v279_v19 = vadd.f32 %v253_v17, %v236_v15  ;;  %v237_v20 = vld [vmem:[%s840_s29 + $0x20] sm:$0xff]  ;;  %v238_v25 = vld [vmem:[%s840_s29 + $0x28] sm:$0xff]  ;;  %p334_p5 = scmp.lt.s32.totalorder (%p984_p6), %s333_s3, 13 }
  0x74   : > { %302 = vst [vmem:[%s855_s20 + $0x20] sm:$0xff] %v276_v13  ;;  %303 = vst [vmem:[%s855_s20 + $0x28] sm:$0xff] %v277_v14  ;;  %v280_v23 = vadd.f32 %v254_v21, %v237_v20  ;;  %v281_v24 = vadd.f32 %v255_v22, %v237_v20  ;;  %v256_v26 = vld [vmem:[%s832_s28 + $0x50] sm:$0xff]  ;;  %v257_v27 = vld [vmem:[%s832_s28 + $0x58] sm:$0xff] }
  0x75   : > { %304 = vst [vmem:[%s855_s20 + $0x30] sm:$0xff] %v278_v18  ;;  %305 = vst [vmem:[%s855_s20 + $0x38] sm:$0xff] %v279_v19  ;;  %v282_v28 = vadd.f32 %v256_v26, %v238_v25  ;;  %v283_v29 = vadd.f32 %v257_v27, %v238_v25  ;;  %v239_v30 = vld [vmem:[%s840_s29 + $0x30] sm:$0xff]  ;;  %v258_v31 = vld [vmem:[%s832_s28 + $0x60] sm:$0xff] }
  0x76   : > { %v259_v32 = vld [vmem:[%s832_s28 + $0x68] sm:$0xff]  ;;  %306 = vst [vmem:[%s855_s20 + $0x40] sm:$0xff] %v280_v23  ;;  %307 = vst [vmem:[%s855_s20 + $0x48] sm:$0xff] %v281_v24  ;;  %v284_v33 = vadd.f32 %v258_v31, %v239_v30  ;;  %v240_v35 = vld [vmem:[%s840_s29 + $0x38] sm:$0xff] }
  0x77   : > { %v285_v34 = vadd.f32 %v259_v32, %v239_v30  ;;  %v260_v36 = vld [vmem:[%s832_s28 + $0x70] sm:$0xff]  ;;  %v261_v37 = vld [vmem:[%s832_s28 + $0x78] sm:$0xff]  ;;  %308 = vst [vmem:[%s855_s20 + $0x50] sm:$0xff] %v282_v28  ;;  %309 = vst [vmem:[%s855_s20 + $0x58] sm:$0xff] %v283_v29 }
  0x78   : > { %v286_v38 = vadd.f32 %v260_v36, %v240_v35  ;;  %v287_v39 = vadd.f32 %v261_v37, %v240_v35  ;;  %v241_v40 = vld [vmem:[%s840_s29 + $0x40] sm:$0xff]  ;;  %v263_v42 = vld [vmem:[%s832_s28 + $0x88] sm:$0xff]  ;;  %310 = vst [vmem:[%s855_s20 + $0x60] sm:$0xff] %v284_v33  ;;  %v264_v46 = vld [vmem:[%s832_s28 + $0x90] sm:$0xff] }
  0x79   : > { %v262_v41 = vld [vmem:[%s832_s28 + $0x80] sm:$0xff]  ;;  %311 = vst [vmem:[%s855_s20 + $0x68] sm:$0xff] %v285_v34  ;;  %v289_v44 = vadd.f32 %v263_v42, %v241_v40  ;;  %v265_v47 = vld [vmem:[%s832_s28 + $0x98] sm:$0xff]  ;;  %v243_v50 = vld [vmem:[%s840_s29 + $0x50] sm:$0xff] }
  0x7a   : > { %v288_v43 = vadd.f32 %v262_v41, %v241_v40  ;;  %v242_v45 = vld [vmem:[%s840_s29 + $0x48] sm:$0xff]  ;;  %312 = vst [vmem:[%s855_s20 + $0x70] sm:$0xff] %v286_v38  ;;  %313 = vst [vmem:[%s855_s20 + $0x78] sm:$0xff] %v287_v39  ;;  %v244_v55 = vld [vmem:[%s840_s29 + $0x58] sm:$0xff]  ;;  %331 = sbr.rel (!%p984_p6) target bundleno = 157 (0x9d), region = 40 }
  0x7b   : > { %v290_v48 = vadd.f32 %v264_v46, %v242_v45  ;;  %v291_v49 = vadd.f32 %v265_v47, %v242_v45  ;;  %v266_v51 = vld [vmem:[%s832_s28 + $0xa0] sm:$0xff]  ;;  %v267_v52 = vld [vmem:[%s832_s28 + $0xa8] sm:$0xff]  ;;  %315 = vst [vmem:[%s855_s20 + $0x88] sm:$0xff] %v289_v44  ;;  %v268_v56 = vld [vmem:[%s832_s28 + $0xb0] sm:$0xff] }
  0x7c   : > { %314 = vst [vmem:[%s855_s20 + $0x80] sm:$0xff] %v288_v43  ;;  %v292_v53 = vadd.f32 %v266_v51, %v243_v50  ;;  %v293_v54 = vadd.f32 %v267_v52, %v243_v50  ;;  %v269_v57 = vld [vmem:[%s832_s28 + $0xb8] sm:$0xff]  ;;  %v294_v58 = vadd.f32 %v268_v56, %v244_v55  ;;  %v270_v61 = vld [vmem:[%s832_s28 + $0xc0] sm:$0xff]  ;;  %v271_v62 = vld [vmem:[%s832_s28 + $0xc8] sm:$0xff] }
  0x7d   : > { %316 = vst [vmem:[%s855_s20 + $0x90] sm:$0xff] %v290_v48  ;;  %317 = vst [vmem:[%s855_s20 + $0x98] sm:$0xff] %v291_v49  ;;  %v295_v59 = vadd.f32 %v269_v57, %v244_v55  ;;  %v245_v60 = vld [vmem:[%s840_s29 + $0x60] sm:$0xff] }
  0x7e   : > { %318 = vst [vmem:[%s855_s20 + $0xa0] sm:$0xff] %v292_v53  ;;  %319 = vst [vmem:[%s855_s20 + $0xa8] sm:$0xff] %v293_v54  ;;  %v296_v63 = vadd.f32 %v270_v61, %v245_v60  ;;  %v297_v0 = vadd.f32 %v271_v62, %v245_v60 }
  0x7f   : > { %320 = vst [vmem:[%s855_s20 + $0xb0] sm:$0xff] %v294_v58  ;;  %321 = vst [vmem:[%s855_s20 + $0xb8] sm:$0xff] %v295_v59 }
  0x80   : > { %322 = vst [vmem:[%s855_s20 + $0xc0] sm:$0xff] %v296_v63  ;;  %323 = vst [vmem:[%s855_s20 + $0xc8] sm:$0xff] %v297_v0 }
  0x81   : > { %s996_s3 = smov (!%p334_p5, %s333_s3), 13 }
  0x82   : > { %s917_s5 = sshll.u32 %s996_s3, 8 }
  0x83   : > { %s339_s6 = ssub.s32 3328, %s917_s5 }
  0x84   : > { %340 = vsyncadd %s325_s25, %s339_s6  ;;  %p460_p1 = scmp.ne.s32.totalorder %s917_s5, 0  ;;  %s475_s21 = smul.u32 3328, %s699_s13 }
  0x85   : > { %s346_s8 = sshll.u32 %s855_s20, 4  ;;  %s660_s19 = smov [#allocation7]   ;;  %s930_s8 = int_to_ptr.vmem [resolvable:$true] %s346_s8 }
  0x86   : > { %s928_s23 = scalar_lea.hbm %s978_s2, %s475_s21  ;;  %s582_s27 = scalar_lea.vmem %s930_s8, %s917_s5 }
  0x87   : > { %p583_p3 = scmp.ne.s32.totalorder %s930_s8, %s582_s27  ;;  %s586_s7 = sshll.u32 %s660_s19, 4  ;;  %s587_s7 = int_to_ptr.vmem [resolvable:$false] %s586_s7 }
  0x88   : > { %s588_s13 = scalar_lea.vmem %s587_s7, 6656  ;;  %p589_p9 = scmp.lt.s32.totalorder %s930_s8, %s587_s7 }
  0x89   : > { %p584_p4 = pnand %p583_p3, %p460_p1  ;;  %p590_p10 = scmp.lt.s32.totalorder %s588_s13, %s582_s27 }
  0x8b   : > { %p585_p7 = pneg %p584_p4  ;;  %p591_p11 = por %p590_p10, %p589_p9 }
  0x8d   : > { %p592_p2 = pnand %p591_p11, %p585_p7 }
  0x8f   : > { %595 = shalt.err (!%p592_p2)
}
  0x90   : > { %s596_s26 = scalar_lea.hbm %s928_s23, %s917_s5  ;;  %s600_s24 = scalar_lea.hbm %s978_s2, 6400 }
  0x91   : > { %p597_p8 = scmp.ne.s32.totalorder %s928_s23, %s596_s26  ;;  %p601_p0 = scmp.lt.u32.totalorder %s928_s23, %s978_s2 }
  0x92   : > { %p602_p6 = scmp.lt.u32.totalorder %s600_s24, %s596_s26  ;;  %p604_p3 = scmp.lt.u32.totalorder %s596_s26, %s928_s23 }
  0x93   : > { %p598_p13 = pnand %p597_p8, %p460_p1 }
  0x94   : > { %p603_p5 = por %p602_p6, %p601_p0 }
  0x95   : > { %p599_p12 = pneg %p598_p13 }
  0x96   : > { %p605_p4 = por %p604_p3, %p603_p5 }
  0x98   : > { %p606_p7 = pnand %p605_p4, %p599_p12 }
  0x9a   : > { %609 = shalt.err (!%p606_p7)
}
  0x9b   : > { %s661_s30 = smov 256   ;;  %s662_s3 = smov 16  }
  0x9c   : > { %352 = dma.vmem_to_hbm [thread:$0]  (%p460_p1), %s930_s8, %s917_s5, %s928_s23, %s325_s25, %s661_s30, %s661_s30, %s662_s3  }
  0x9d PF: > { %s361_s6 = sand.u32 1, %s640_s9   ;;  %p985_p9 = scmp.ne.s32.totalorder %s983_s22, 0 }
  0x9e   : > { %p986_p10 = scmp.ge.s32.totalorder %s652_s12, 2  ;;  %s362_s21 = scalar_lea.sflag [#allocation4], %s361_s6 }
  0xa0   : > { %p484_p11 = pnand %p986_p10, %p985_p9 }
  0xa2   : > { %635 = dma.done.wait (!%p484_p11), %s362_s21, 3328  }
  0xa3   : > { %637 = vsyncadd (!%p484_p11), %s362_s21, 4294963968  ;;  %p18_p2 = scmp.ge.s32.totalorder %s703_s15, 4   ;;  %s987_s9 = smov %s644_s10 }
  0xa4   : > { %s988_s10 = smov %s648_s11  ;;  %s989_s11 = smov %s715_s18 }
  0xa5   : > { %s990_s12 = smov %s703_s15  ;;  %20 = sbr.rel (!%p18_p2) target bundleno = 7 (0x7), region = 86 }
  0xac   :  { %367 = vsyncpa [#allocation3], 1 }
  0xad   :  { %369 = vsyncpa [#allocation3 + $0x1], 1 }
  0xae   :  { %370 = vsyncpa [#allocation6], 1 }
  0xaf   :  { %372 = vsyncpa [#allocation6 + $0x1], 1 }
  0xb0   :  { %373 = vsyncpa [#allocation4], 1 }
  0xb1   :  { %375 = vsyncpa [#allocation4 + $0x1], 1 }

</bundles_post_ra>
